<compile_context>
chip_gen: v7x
topology: tpu7x:2x2x1
jax: 0.10.0
libtpu: 0.0.40
codegen_flags: <defaults>
</compile_context>

<pallas_src>
import functools

import jax
import jax.numpy as jnp
from jax import lax
from jax.experimental import pallas as pl
from jax.experimental.pallas import tpu as pltpu


def _bottleneck_kernel(H, W, d,
                       x_ref, w0_ref, s0_ref, t0_ref,
                       w1_ref, s1_ref, t1_ref,
                       w2_ref, s2_ref, t2_ref,
                       al_ref, out_ref):
    """One batch image per grid step.  All activation tiles are (C, H*W): lane dense."""
    HW = H * W
    al = al_ref[...]                                     # (4, 1) PReLU slopes

    def prelu(v, i):
        a = al[i:i + 1, :]                               # (1, 1) -> broadcasts
        return jnp.where(v >= 0.0, v, a * v)

    x = x_ref[...]                                       # (Cin, HW) float32

    # ---- block0: 1x1 conv + (bias+BN folded) scale/shift + PReLU -------------------
    y = jnp.dot(w0_ref[...], x, preferred_element_type=jnp.float32)    # (Cp, HW)
    y = prelu(y * s0_ref[...] + t0_ref[...], 0)

    # ---- conv1: 3x3 dilated conv as ONE im2col matmul -------------------------------
    # A shift by (dy*W + dx) in the flattened (h*W + w) index equals a (dy, dx)
    # spatial shift, except where w + dx wraps across a row; those lanes are zeroed
    # with a per-column mask.  Out-of-image rows fall into the flat zero padding.
    Cp = y.shape[0]
    P = d * (W + 1)                                      # max |flat shift|
    zpad = jnp.zeros((Cp, P), jnp.float32)
    ypad = jnp.concatenate([zpad, y, zpad], axis=1)      # (Cp, HW + 2P)

    wpos = lax.broadcasted_iota(jnp.int32, (1, HW), 1) % W
    mask_l = wpos >= d                                   # valid lanes when dx = -d
    mask_r = wpos < (W - d)                              # valid lanes when dx = +d

    taps = []
    for ky in range(3):
        for kx in range(3):
            off = (ky - 1) * d * W + (kx - 1) * d
            t = ypad[:, P + off:P + off + HW]            # (Cp, HW) static lane slice
            if kx == 0:
                t = jnp.where(mask_l, t, 0.0)
            elif kx == 2:
                t = jnp.where(mask_r, t, 0.0)
            taps.append(t)
    col = jnp.concatenate(taps, axis=0)                  # (9*Cp, HW) im2col, aligned
    c = jnp.dot(w1_ref[...], col, preferred_element_type=jnp.float32)  # (Cp, HW)
    c = prelu(c * s1_ref[...] + t1_ref[...], 1)

    # ---- block2: 1x1 conv + scale/shift + PReLU --------------------------------------
    z = jnp.dot(w2_ref[...], c, preferred_element_type=jnp.float32)    # (Cout, HW)
    z = prelu(z * s2_ref[...] + t2_ref[...], 2)

    # ---- Dropout(p=0.01): identity in eval mode --------------------------------------
    # TODO(synk): training-mode dropout (scaled Bernoulli mask, p=0.01) not implemented.

    # ---- residual add + PReLU3 --------------------------------------------------------
    out_ref[...] = prelu(x + z, 3)


def _prepare_kernel_params(p, eps=1e-5):
    """Fold conv bias + BatchNorm (eval) into per-channel scale/shift, pad the mid
    channel count up to a multiple of 8 (sublane group) and lay conv1 out for im2col."""
    Cmid, Cin = p['w0'].shape
    Cout = p['w2'].shape[0]
    Cp = ((Cmid + 7) // 8) * 8

    def fold(gamma, beta, mean, var, bias):
        s = gamma / jnp.sqrt(var + eps)
        return s, beta + (bias - mean) * s

    s0, t0 = fold(p['g0'], p['be0'], p['m0'], p['v0'], p['b0'])
    s1, t1 = fold(p['g1'], p['be1'], p['m1'], p['v1'], p['b1'])
    s2, t2 = fold(p['g2'], p['be2'], p['m2'], p['v2'], p['b2'])

    def pad_vec(v):
        return jnp.zeros((Cp, 1), jnp.float32).at[:Cmid, 0].set(v)

    w0k = jnp.zeros((Cp, Cin), jnp.float32).at[:Cmid].set(p['w0'])
    # conv1 weight OIHW (Cmid, Cmid, 3, 3) -> (Cp, 9*Cp), tap-major, sublane aligned.
    w1k = jnp.zeros((Cp, 3, 3, Cp), jnp.float32)
    w1k = w1k.at[:Cmid, :, :, :Cmid].set(jnp.transpose(p['w1'], (0, 2, 3, 1)))
    w1k = w1k.reshape(Cp, 9 * Cp)
    w2k = jnp.zeros((Cout, Cp), jnp.float32).at[:, :Cmid].set(p['w2'])

    alphas = jnp.stack([p['a0'], p['a1'], p['a2'], p['a3']]).reshape(4, 1)
    return dict(w0=w0k, s0=pad_vec(s0), t0=pad_vec(t0),
                w1=w1k, s1=pad_vec(s1), t1=pad_vec(t1),
                w2=w2k, s2=s2.reshape(Cout, 1), t2=t2.reshape(Cout, 1),
                alphas=alphas.astype(jnp.float32))


def bottleneck_downsampling_dilated_conv(x_nchw, params, dilation):
    """x_nchw: (N, Cin, H, W) float32. Returns (N, Cout, H, W) float32 (eval mode)."""
    N, Cin, H, W = x_nchw.shape
    kp = _prepare_kernel_params(params)
    Cp = kp['w0'].shape[0]
    Cout = kp['w2'].shape[0]
    assert Cin == Cout, "residual add in the module requires in_dim == out_dim"
    HW = H * W

    x_flat = x_nchw.reshape(N, Cin, HW).astype(jnp.float32)   # free reshape, lane dense

    kernel = functools.partial(_bottleneck_kernel, H, W, dilation)

    def const_spec(shape):
        return pl.BlockSpec(shape, lambda n: (0,) * len(shape))

    out_flat = pl.pallas_call(
        kernel,
        out_shape=jax.ShapeDtypeStruct((N, Cout, HW), jnp.float32),
        grid=(N,),
        in_specs=[
            pl.BlockSpec((None, Cin, HW), lambda n: (n, 0, 0)),   # x: one image / step
            const_spec((Cp, Cin)),        # w0
            const_spec((Cp, 1)),          # s0 (BN*conv-bias folded scale)
            const_spec((Cp, 1)),          # t0 (folded shift)
            const_spec((Cp, 9 * Cp)),     # w1 in im2col layout
            const_spec((Cp, 1)),          # s1
            const_spec((Cp, 1)),          # t1
            const_spec((Cout, Cp)),       # w2
            const_spec((Cout, 1)),        # s2
            const_spec((Cout, 1)),        # t2
            const_spec((4, 1)),           # PReLU slopes
        ],
        out_specs=pl.BlockSpec((None, Cout, HW), lambda n: (n, 0, 0)),
        compiler_params=pltpu.CompilerParams(
            dimension_semantics=("parallel",),       # batch axis -> 2 TCs on v7x
            vmem_limit_bytes=32 * 1024 * 1024,
        ),
    )(x_flat, kp['w0'], kp['s0'], kp['t0'], kp['w1'], kp['s1'], kp['t1'],
      kp['w2'], kp['s2'], kp['t2'], kp['alphas'])

    return out_flat.reshape(N, Cout, H, W)


def init_params(key, in_dim, projection_factor, out_dim):
    """Deterministic synthetic parameters matching the PyTorch module's shapes."""
    mid = in_dim // projection_factor
    ks = jax.random.split(key, 18)

    def bn(k0, k1, k2, k3, c):
        return (1.0 + 0.1 * jax.random.normal(k0, (c,), jnp.float32),    # gamma
                0.1 * jax.random.normal(k1, (c,), jnp.float32),          # beta
                0.1 * jax.random.normal(k2, (c,), jnp.float32),          # running mean
                1.0 + 0.1 * jax.random.uniform(k3, (c,), jnp.float32))   # running var

    p = {}
    p['w0'] = 0.2 * jax.random.normal(ks[0], (mid, in_dim), jnp.float32)
    p['b0'] = 0.1 * jax.random.normal(ks[1], (mid,), jnp.float32)
    p['g0'], p['be0'], p['m0'], p['v0'] = bn(ks[2], ks[3], ks[4], ks[5], mid)

    p['w1'] = 0.2 * jax.random.normal(ks[6], (mid, mid, 3, 3), jnp.float32)   # OIHW
    p['b1'] = 0.1 * jax.random.normal(ks[7], (mid,), jnp.float32)
    p['g1'], p['be1'], p['m1'], p['v1'] = bn(ks[8], ks[9], ks[10], ks[11], mid)

    p['w2'] = 0.2 * jax.random.normal(ks[12], (out_dim, mid), jnp.float32)
    p['b2'] = 0.1 * jax.random.normal(ks[13], (out_dim,), jnp.float32)
    p['g2'], p['be2'], p['m2'], p['v2'] = bn(ks[14], ks[15], ks[16], ks[17], out_dim)

    for name in ('a0', 'a1', 'a2', 'a3'):                 # PReLU default init 0.25
        p[name] = jnp.float32(0.25)
    return p


def reference(x_nchw, p, dilation, eps=1e-5):
    """Pure-JAX (eval-mode) reference of the module's forward pass, in NCHW."""
    def bn(v, g, b, m, var):
        s = g / jnp.sqrt(var + eps)
        return (v - m[:, None, None]) * s[:, None, None] + b[:, None, None]

    def prelu(v, a):
        return jnp.where(v >= 0.0, v, a * v)

    x = x_nchw.astype(jnp.float32)
    d = dilation

    y = jnp.einsum('oc,nchw->nohw', p['w0'], x) + p['b0'][:, None, None]
    y = prelu(bn(y, p['g0'], p['be0'], p['m0'], p['v0']), p['a0'])

    c = lax.conv_general_dilated(y, p['w1'], (1, 1), [(d, d), (d, d)],
                                 rhs_dilation=(d, d),
                                 dimension_numbers=('NCHW', 'OIHW', 'NCHW'))
    c = c + p['b1'][:, None, None]
    c = prelu(bn(c, p['g1'], p['be1'], p['m1'], p['v1']), p['a1'])

    z = jnp.einsum('oc,nchw->nohw', p['w2'], c) + p['b2'][:, None, None]
    z = prelu(bn(z, p['g2'], p['be2'], p['m2'], p['v2']), p['a2'])

    return prelu(x + z, p['a3'])


if __name__ == "__main__":
    in_dim, projection_factor, out_dim, dilation = 16, 4, 16, 2
    N, H, W = 2, 16, 16

    key = jax.random.PRNGKey(0)
    kx, kp = jax.random.split(key)
    x = jax.random.normal(kx, (N, in_dim, H, W), jnp.float32)   # NCHW input
    params = init_params(kp, in_dim, projection_factor, out_dim)

    out = bottleneck_downsampling_dilated_conv(x, params, dilation)
    out = jax.block_until_ready(out)

    ref = reference(x, params, dilation)
    assert out.shape == (N, out_dim, H, W), out.shape
    max_err = float(jnp.max(jnp.abs(out - ref)))
    assert jnp.allclose(out, ref, rtol=1e-3, atol=1e-3), max_err

    print("KERNEL_OK")
</pallas_src>

<mosaic_0001>
module attributes {stable_mosaic.version = 11 : i64} {
  func.func @_bottleneck_kernel(%arg0: i32, %arg1: memref<1x16x256xf32, #tpu.memory_space<vmem>>, %arg2: memref<8x16xf32, #tpu.memory_space<vmem>>, %arg3: memref<8x1xf32, #tpu.memory_space<vmem>>, %arg4: memref<8x1xf32, #tpu.memory_space<vmem>>, %arg5: memref<8x72xf32, #tpu.memory_space<vmem>>, %arg6: memref<8x1xf32, #tpu.memory_space<vmem>>, %arg7: memref<8x1xf32, #tpu.memory_space<vmem>>, %arg8: memref<16x8xf32, #tpu.memory_space<vmem>>, %arg9: memref<16x1xf32, #tpu.memory_space<vmem>>, %arg10: memref<16x1xf32, #tpu.memory_space<vmem>>, %arg11: memref<4x1xf32, #tpu.memory_space<vmem>>, %arg12: memref<1x16x256xf32, #tpu.memory_space<vmem>>) attributes {dimension_semantics = [#tpu.dimension_semantics<parallel>], iteration_bounds = array<i64: 2>, scalar_prefetch = 0 : i64, scratch_operands = 0 : i64, tpu.core_type = #tpu.core_type<tc>, window_params = [{transform_indices = @transform_0, window_bounds = array<i64: 1, 16, 256>}, {pipeline_mode = #tpu.pipeline_mode<synchronous>, transform_indices = @transform_1, window_bounds = array<i64: 8, 16>}, {pipeline_mode = #tpu.pipeline_mode<synchronous>, transform_indices = @transform_2, window_bounds = array<i64: 8, 1>}, {pipeline_mode = #tpu.pipeline_mode<synchronous>, transform_indices = @transform_3, window_bounds = array<i64: 8, 1>}, {pipeline_mode = #tpu.pipeline_mode<synchronous>, transform_indices = @transform_4, window_bounds = array<i64: 8, 72>}, {pipeline_mode = #tpu.pipeline_mode<synchronous>, transform_indices = @transform_5, window_bounds = array<i64: 8, 1>}, {pipeline_mode = #tpu.pipeline_mode<synchronous>, transform_indices = @transform_6, window_bounds = array<i64: 8, 1>}, {pipeline_mode = #tpu.pipeline_mode<synchronous>, transform_indices = @transform_7, window_bounds = array<i64: 16, 8>}, {pipeline_mode = #tpu.pipeline_mode<synchronous>, transform_indices = @transform_8, window_bounds = array<i64: 16, 1>}, {pipeline_mode = #tpu.pipeline_mode<synchronous>, transform_indices = @transform_9, window_bounds = array<i64: 16, 1>}, {pipeline_mode = #tpu.pipeline_mode<synchronous>, transform_indices = @transform_10, window_bounds = array<i64: 4, 1>}, {transform_indices = @transform_11, window_bounds = array<i64: 1, 16, 256>}]} {
    %c0 = arith.constant 0 : index
    %c0_0 = arith.constant 0 : index
    %0 = vector.load %arg11[%c0, %c0_0] : memref<4x1xf32, #tpu.memory_space<vmem>>, vector<4x1xf32>
    %c0_1 = arith.constant 0 : index
    %c0_2 = arith.constant 0 : index
    %c0_3 = arith.constant 0 : index
    %1 = vector.load %arg1[%c0_1, %c0_2, %c0_3] : memref<1x16x256xf32, #tpu.memory_space<vmem>>, vector<1x16x256xf32>
    %2 = vector.shape_cast %1 : vector<1x16x256xf32> to vector<16x256xf32>
    %c0_4 = arith.constant 0 : index
    %c0_5 = arith.constant 0 : index
    %3 = vector.load %arg2[%c0_4, %c0_5] : memref<8x16xf32, #tpu.memory_space<vmem>>, vector<8x16xf32>
    %cst = arith.constant dense<0.000000e+00> : vector<8x256xf32>
    %4 = tpu.matmul %3, %2, %cst {dimension_numbers = #tpu.dot_dimension_numbers<[1], [0], [0], [1], [0, 0, 1, 1], [], []>} : vector<8x16xf32>, vector<16x256xf32>, vector<8x256xf32> -> vector<8x256xf32>
    %c0_6 = arith.constant 0 : index
    %c0_7 = arith.constant 0 : index
    %5 = vector.load %arg3[%c0_6, %c0_7] : memref<8x1xf32, #tpu.memory_space<vmem>>, vector<8x1xf32>
    %6 = vector.broadcast %5 : vector<8x1xf32> to vector<8x256xf32>
    %7 = arith.mulf %4, %6 : vector<8x256xf32>
    %c0_8 = arith.constant 0 : index
    %c0_9 = arith.constant 0 : index
    %8 = vector.load %arg4[%c0_8, %c0_9] : memref<8x1xf32, #tpu.memory_space<vmem>>, vector<8x1xf32>
    %9 = vector.broadcast %8 : vector<8x1xf32> to vector<8x256xf32>
    %10 = arith.addf %7, %9 : vector<8x256xf32>
    %11 = vector.extract_strided_slice %0 {offsets = [0, 0], sizes = [1, 1], strides = [1, 1]} : vector<4x1xf32> to vector<1x1xf32>
    %cst_10 = arith.constant 0.000000e+00 : f32
    %12 = vector.broadcast %cst_10 : f32 to vector<8x256xf32>
    %13 = arith.cmpf oge, %10, %12 : vector<8x256xf32>
    %14 = vector.broadcast %11 : vector<1x1xf32> to vector<8x256xf32>
    %15 = arith.mulf %14, %10 : vector<8x256xf32>
    %16 = arith.select %13, %10, %15 : vector<8x256xi1>, vector<8x256xf32>
    %cst_11 = arith.constant 0.000000e+00 : f32
    %17 = vector.broadcast %cst_11 : f32 to vector<8x34xf32>
    %18 = tpu.concatenate %17, %16, %17 in 1 : vector<8x34xf32>, vector<8x256xf32>, vector<8x34xf32> -> vector<8x324xf32>
    %19 = tpu.iota {dimensions = array<i32: 1>} : vector<1x256xi32>
    %c16_i32 = arith.constant 16 : i32
    %c0_i32 = arith.constant 0 : i32
    %20 = arith.cmpi eq, %c16_i32, %c0_i32 : i32
    %c1_i32 = arith.constant 1 : i32
    %21 = arith.select %20, %c1_i32, %c16_i32 : i32
    %22 = vector.broadcast %21 : i32 to vector<1x256xi32>
    %23 = arith.remsi %19, %22 : vector<1x256xi32>
    %c0_i32_12 = arith.constant 0 : i32
    %24 = vector.broadcast %c0_i32_12 : i32 to vector<1x256xi32>
    %25 = arith.cmpi ne, %23, %24 : vector<1x256xi32>
    %c0_i32_13 = arith.constant 0 : i32
    %26 = vector.broadcast %c0_i32_13 : i32 to vector<1x256xi32>
    %27 = arith.cmpi slt, %23, %26 : vector<1x256xi32>
    %c0_i32_14 = arith.constant 0 : i32
    %28 = arith.cmpi slt, %21, %c0_i32_14 : i32
    %29 = vector.broadcast %28 : i1 to vector<1x256xi1>
    %30 = vector.broadcast %29 : vector<1x256xi1> to vector<1x256xi1>
    %31 = arith.xori %27, %30 : vector<1x256xi1>
    %32 = arith.andi %31, %25 : vector<1x256xi1>
    %33 = vector.broadcast %21 : i32 to vector<1x256xi32>
    %34 = arith.addi %23, %33 : vector<1x256xi32>
    %35 = arith.select %32, %34, %23 : vector<1x256xi1>, vector<1x256xi32>
    %c2_i32 = arith.constant 2 : i32
    %36 = vector.broadcast %c2_i32 : i32 to vector<1x256xi32>
    %37 = arith.cmpi sge, %35, %36 : vector<1x256xi32>
    %c14_i32 = arith.constant 14 : i32
    %38 = vector.broadcast %c14_i32 : i32 to vector<1x256xi32>
    %39 = arith.cmpi slt, %35, %38 : vector<1x256xi32>
    %40 = vector.extract_strided_slice %18 {offsets = [0, 0], sizes = [8, 256], strides = [1, 1]} : vector<8x324xf32> to vector<8x256xf32>
    %cst_15 = arith.constant 0.000000e+00 : f32
    %41 = vector.shape_cast %37 : vector<1x256xi1> to vector<1x256xi1>
    %42 = vector.broadcast %41 : vector<1x256xi1> to vector<8x256xi1>
    %43 = vector.broadcast %cst_15 : f32 to vector<8x256xf32>
    %44 = arith.select %42, %40, %43 : vector<8x256xi1>, vector<8x256xf32>
    %45 = vector.extract_strided_slice %18 {offsets = [0, 2], sizes = [8, 256], strides = [1, 1]} : vector<8x324xf32> to vector<8x256xf32>
    %46 = vector.extract_strided_slice %18 {offsets = [0, 4], sizes = [8, 256], strides = [1, 1]} : vector<8x324xf32> to vector<8x256xf32>
    %cst_16 = arith.constant 0.000000e+00 : f32
    %47 = vector.shape_cast %39 : vector<1x256xi1> to vector<1x256xi1>
    %48 = vector.broadcast %47 : vector<1x256xi1> to vector<8x256xi1>
    %49 = vector.broadcast %cst_16 : f32 to vector<8x256xf32>
    %50 = arith.select %48, %46, %49 : vector<8x256xi1>, vector<8x256xf32>
    %51 = vector.extract_strided_slice %18 {offsets = [0, 32], sizes = [8, 256], strides = [1, 1]} : vector<8x324xf32> to vector<8x256xf32>
    %cst_17 = arith.constant 0.000000e+00 : f32
    %52 = vector.shape_cast %37 : vector<1x256xi1> to vector<1x256xi1>
    %53 = vector.broadcast %52 : vector<1x256xi1> to vector<8x256xi1>
    %54 = vector.broadcast %cst_17 : f32 to vector<8x256xf32>
    %55 = arith.select %53, %51, %54 : vector<8x256xi1>, vector<8x256xf32>
    %56 = vector.extract_strided_slice %18 {offsets = [0, 34], sizes = [8, 256], strides = [1, 1]} : vector<8x324xf32> to vector<8x256xf32>
    %57 = vector.extract_strided_slice %18 {offsets = [0, 36], sizes = [8, 256], strides = [1, 1]} : vector<8x324xf32> to vector<8x256xf32>
    %cst_18 = arith.constant 0.000000e+00 : f32
    %58 = vector.shape_cast %39 : vector<1x256xi1> to vector<1x256xi1>
    %59 = vector.broadcast %58 : vector<1x256xi1> to vector<8x256xi1>
    %60 = vector.broadcast %cst_18 : f32 to vector<8x256xf32>
    %61 = arith.select %59, %57, %60 : vector<8x256xi1>, vector<8x256xf32>
    %62 = vector.extract_strided_slice %18 {offsets = [0, 64], sizes = [8, 256], strides = [1, 1]} : vector<8x324xf32> to vector<8x256xf32>
    %cst_19 = arith.constant 0.000000e+00 : f32
    %63 = vector.shape_cast %37 : vector<1x256xi1> to vector<1x256xi1>
    %64 = vector.broadcast %63 : vector<1x256xi1> to vector<8x256xi1>
    %65 = vector.broadcast %cst_19 : f32 to vector<8x256xf32>
    %66 = arith.select %64, %62, %65 : vector<8x256xi1>, vector<8x256xf32>
    %67 = vector.extract_strided_slice %18 {offsets = [0, 66], sizes = [8, 256], strides = [1, 1]} : vector<8x324xf32> to vector<8x256xf32>
    %68 = vector.extract_strided_slice %18 {offsets = [0, 68], sizes = [8, 256], strides = [1, 1]} : vector<8x324xf32> to vector<8x256xf32>
    %cst_20 = arith.constant 0.000000e+00 : f32
    %69 = vector.shape_cast %39 : vector<1x256xi1> to vector<1x256xi1>
    %70 = vector.broadcast %69 : vector<1x256xi1> to vector<8x256xi1>
    %71 = vector.broadcast %cst_20 : f32 to vector<8x256xf32>
    %72 = arith.select %70, %68, %71 : vector<8x256xi1>, vector<8x256xf32>
    %73 = tpu.concatenate %44, %45, %50, %55, %56, %61, %66, %67, %72 in 0 : vector<8x256xf32>, vector<8x256xf32>, vector<8x256xf32>, vector<8x256xf32>, vector<8x256xf32>, vector<8x256xf32>, vector<8x256xf32>, vector<8x256xf32>, vector<8x256xf32> -> vector<72x256xf32>
    %c0_21 = arith.constant 0 : index
    %c0_22 = arith.constant 0 : index
    %74 = vector.load %arg5[%c0_21, %c0_22] : memref<8x72xf32, #tpu.memory_space<vmem>>, vector<8x72xf32>
    %cst_23 = arith.constant dense<0.000000e+00> : vector<8x256xf32>
    %75 = tpu.matmul %74, %73, %cst_23 {dimension_numbers = #tpu.dot_dimension_numbers<[1], [0], [0], [1], [0, 0, 1, 1], [], []>} : vector<8x72xf32>, vector<72x256xf32>, vector<8x256xf32> -> vector<8x256xf32>
    %c0_24 = arith.constant 0 : index
    %c0_25 = arith.constant 0 : index
    %76 = vector.load %arg6[%c0_24, %c0_25] : memref<8x1xf32, #tpu.memory_space<vmem>>, vector<8x1xf32>
    %77 = vector.broadcast %76 : vector<8x1xf32> to vector<8x256xf32>
    %78 = arith.mulf %75, %77 : vector<8x256xf32>
    %c0_26 = arith.constant 0 : index
    %c0_27 = arith.constant 0 : index
    %79 = vector.load %arg7[%c0_26, %c0_27] : memref<8x1xf32, #tpu.memory_space<vmem>>, vector<8x1xf32>
    %80 = vector.broadcast %79 : vector<8x1xf32> to vector<8x256xf32>
    %81 = arith.addf %78, %80 : vector<8x256xf32>
    %82 = vector.extract_strided_slice %0 {offsets = [1, 0], sizes = [1, 1], strides = [1, 1]} : vector<4x1xf32> to vector<1x1xf32>
    %cst_28 = arith.constant 0.000000e+00 : f32
    %83 = vector.broadcast %cst_28 : f32 to vector<8x256xf32>
    %84 = arith.cmpf oge, %81, %83 : vector<8x256xf32>
    %85 = vector.broadcast %82 : vector<1x1xf32> to vector<8x256xf32>
    %86 = arith.mulf %85, %81 : vector<8x256xf32>
    %87 = arith.select %84, %81, %86 : vector<8x256xi1>, vector<8x256xf32>
    %c0_29 = arith.constant 0 : index
    %c0_30 = arith.constant 0 : index
    %88 = vector.load %arg8[%c0_29, %c0_30] : memref<16x8xf32, #tpu.memory_space<vmem>>, vector<16x8xf32>
    %cst_31 = arith.constant dense<0.000000e+00> : vector<16x256xf32>
    %89 = tpu.matmul %88, %87, %cst_31 {dimension_numbers = #tpu.dot_dimension_numbers<[1], [0], [0], [1], [0, 0, 1, 1], [], []>} : vector<16x8xf32>, vector<8x256xf32>, vector<16x256xf32> -> vector<16x256xf32>
    %c0_32 = arith.constant 0 : index
    %c0_33 = arith.constant 0 : index
    %90 = vector.load %arg9[%c0_32, %c0_33] : memref<16x1xf32, #tpu.memory_space<vmem>>, vector<16x1xf32>
    %91 = vector.broadcast %90 : vector<16x1xf32> to vector<16x256xf32>
    %92 = arith.mulf %89, %91 : vector<16x256xf32>
    %c0_34 = arith.constant 0 : index
    %c0_35 = arith.constant 0 : index
    %93 = vector.load %arg10[%c0_34, %c0_35] : memref<16x1xf32, #tpu.memory_space<vmem>>, vector<16x1xf32>
    %94 = vector.broadcast %93 : vector<16x1xf32> to vector<16x256xf32>
    %95 = arith.addf %92, %94 : vector<16x256xf32>
    %96 = vector.extract_strided_slice %0 {offsets = [2, 0], sizes = [1, 1], strides = [1, 1]} : vector<4x1xf32> to vector<1x1xf32>
    %cst_36 = arith.constant 0.000000e+00 : f32
    %97 = vector.broadcast %cst_36 : f32 to vector<16x256xf32>
    %98 = arith.cmpf oge, %95, %97 : vector<16x256xf32>
    %99 = vector.broadcast %96 : vector<1x1xf32> to vector<16x256xf32>
    %100 = arith.mulf %99, %95 : vector<16x256xf32>
    %101 = arith.select %98, %95, %100 : vector<16x256xi1>, vector<16x256xf32>
    %102 = arith.addf %2, %101 : vector<16x256xf32>
    %103 = vector.extract_strided_slice %0 {offsets = [3, 0], sizes = [1, 1], strides = [1, 1]} : vector<4x1xf32> to vector<1x1xf32>
    %cst_37 = arith.constant 0.000000e+00 : f32
    %104 = vector.broadcast %cst_37 : f32 to vector<16x256xf32>
    %105 = arith.cmpf oge, %102, %104 : vector<16x256xf32>
    %106 = vector.broadcast %103 : vector<1x1xf32> to vector<16x256xf32>
    %107 = arith.mulf %106, %102 : vector<16x256xf32>
    %108 = arith.select %105, %102, %107 : vector<16x256xi1>, vector<16x256xf32>
    %c0_38 = arith.constant 0 : index
    %c0_39 = arith.constant 0 : index
    %c0_40 = arith.constant 0 : index
    %109 = vector.load %arg12[%c0_38, %c0_39, %c0_40] : memref<1x16x256xf32, #tpu.memory_space<vmem>>, vector<1x16x256xf32>
    %110 = vector.shape_cast %109 : vector<1x16x256xf32> to vector<16x256xf32>
    %111 = vector.shape_cast %108 : vector<16x256xf32> to vector<1x16x256xf32>
    tpu.vector_store %arg12[%c0_38, %c0_39, %c0_40], %111 {strides = array<i32>} : memref<1x16x256xf32, #tpu.memory_space<vmem>>, vector<1x16x256xf32>,
    return
  }
  func.func @transform_0(%arg0: i32) -> (i32, i32, i32) {
    %c0_i32 = arith.constant 0 : i32
    %c0_i32_0 = arith.constant 0 : i32
    %c0_i32_1 = arith.constant 0 : i32
    return %arg0, %c0_i32, %c0_i32_0 : i32, i32, i32
  }
  func.func @transform_1(%arg0: i32) -> (i32, i32) {
    %c0_i32 = arith.constant 0 : i32
    %c0_i32_0 = arith.constant 0 : i32
    %c0_i32_1 = arith.constant 0 : i32
    return %c0_i32, %c0_i32_0 : i32, i32
  }
  func.func @transform_2(%arg0: i32) -> (i32, i32) {
    %c0_i32 = arith.constant 0 : i32
    %c0_i32_0 = arith.constant 0 : i32
    %c0_i32_1 = arith.constant 0 : i32
    return %c0_i32, %c0_i32_0 : i32, i32
  }
  func.func @transform_3(%arg0: i32) -> (i32, i32) {
    %c0_i32 = arith.constant 0 : i32
    %c0_i32_0 = arith.constant 0 : i32
    %c0_i32_1 = arith.constant 0 : i32
    return %c0_i32, %c0_i32_0 : i32, i32
  }
  func.func @transform_4(%arg0: i32) -> (i32, i32) {
    %c0_i32 = arith.constant 0 : i32
    %c0_i32_0 = arith.constant 0 : i32
    %c0_i32_1 = arith.constant 0 : i32
    return %c0_i32, %c0_i32_0 : i32, i32
  }
  func.func @transform_5(%arg0: i32) -> (i32, i32) {
    %c0_i32 = arith.constant 0 : i32
    %c0_i32_0 = arith.constant 0 : i32
    %c0_i32_1 = arith.constant 0 : i32
    return %c0_i32, %c0_i32_0 : i32, i32
  }
  func.func @transform_6(%arg0: i32) -> (i32, i32) {
    %c0_i32 = arith.constant 0 : i32
    %c0_i32_0 = arith.constant 0 : i32
    %c0_i32_1 = arith.constant 0 : i32
    return %c0_i32, %c0_i32_0 : i32, i32
  }
  func.func @transform_7(%arg0: i32) -> (i32, i32) {
    %c0_i32 = arith.constant 0 : i32
    %c0_i32_0 = arith.constant 0 : i32
    %c0_i32_1 = arith.constant 0 : i32
    return %c0_i32, %c0_i32_0 : i32, i32
  }
  func.func @transform_8(%arg0: i32) -> (i32, i32) {
    %c0_i32 = arith.constant 0 : i32
    %c0_i32_0 = arith.constant 0 : i32
    %c0_i32_1 = arith.constant 0 : i32
    return %c0_i32, %c0_i32_0 : i32, i32
  }
  func.func @transform_9(%arg0: i32) -> (i32, i32) {
    %c0_i32 = arith.constant 0 : i32
    %c0_i32_0 = arith.constant 0 : i32
    %c0_i32_1 = arith.constant 0 : i32
    return %c0_i32, %c0_i32_0 : i32, i32
  }
  func.func @transform_10(%arg0: i32) -> (i32, i32) {
    %c0_i32 = arith.constant 0 : i32
    %c0_i32_0 = arith.constant 0 : i32
    %c0_i32_1 = arith.constant 0 : i32
    return %c0_i32, %c0_i32_0 : i32, i32
  }
  func.func @transform_11(%arg0: i32) -> (i32, i32, i32) {
    %c0_i32 = arith.constant 0 : i32
    %c0_i32_0 = arith.constant 0 : i32
    %c0_i32_1 = arith.constant 0 : i32
    return %arg0, %c0_i32, %c0_i32_0 : i32, i32, i32
  }
}

</mosaic_0001>

<bundles_post_ra>
// kernel: tpu_custom_call.1
= control target key start
LH: loop header
LB: loop body
LE: loop exit
PB: predicated region body
PF: predicated region fallthrough
CT: control target
= control target key end

     0   :  { %16 = vsyncpa [#allocation3], 0  ;;  %s1530_s0 = inlined_call_operand.vmem [shape: f32[2,16,256], index: 0, kind: input, shape index: {}]   ;;  %s1531_s1 = inlined_call_operand.vmem [shape: f32[8,16], index: 1, kind: input, shape index: {}]   ;;  %s1532_s2 = inlined_call_operand.vmem [shape: f32[8,1], index: 2, kind: input, shape index: {}]   ;;  %s1533_s3 = inlined_call_operand.vmem [shape: f32[8,1], index: 3, kind: input, shape index: {}]   ;;  %s1534_s4 = inlined_call_operand.vmem [shape: f32[8,72], index: 4, kind: input, shape index: {}]   ;;  %s1535_s5 = inlined_call_operand.vmem [shape: f32[8,1], index: 5, kind: input, shape index: {}]   ;;  %s1536_s6 = inlined_call_operand.vmem [shape: f32[8,1], index: 6, kind: input, shape index: {}]   ;;  %s1537_s7 = inlined_call_operand.vmem [shape: f32[16,8], index: 7, kind: input, shape index: {}]   ;;  %s1538_s8 = inlined_call_operand.vmem [shape: f32[16,1], index: 8, kind: input, shape index: {}]   ;;  %s1539_s9 = inlined_call_operand.vmem [shape: f32[16,1], index: 9, kind: input, shape index: {}]   ;;  %s1540_s10 = inlined_call_operand.vmem [shape: f32[4,1], index: 10, kind: input, shape index: {}]   ;;  %s1541_s11 = inlined_call_operand.hbm [shape: f32[2,16,256], index: 11, kind: output, shape index: {}]  }
   0x1   :  { %18 = vsyncpa [#allocation3 + $0x1], 0  ;;  %s1277_s17 = smov 0   ;;  %s1279_s18 = smov 0  }
   0x2   :  { %s1281_s19 = smov 0   ;;  %s1283_s20 = smov 0  }
   0x3 LB: > { %s1298_s21 = sadd.s32 4294967295, %s1200_s20   ;;  %s982_s22 = sadd.s32 4294967294, %s1200_s20   ;;  %s1200_s20 = sphi %s1283_s20, %s1559_s20   ;;  %s1196_s19 = sphi %s1281_s19, %s1558_s19   ;;  %s1192_s18 = sphi %s1279_s18, %s1557_s18   ;;  %s1188_s17 = sphi %s1277_s17, %s1556_s17  }
   0x4   : > { %s1302_s23 = sadd.s32 1, %s1200_s20   ;;  %s267_s24 = sadd.s32 1, %s1196_s19 }
   0x5   : > { %s264_s25 = ssub.s32 %s1200_s20, %s1302_s23  ;;  %p277_p0 = scmp.ne.s32.totalorder %s1196_s19, %s1192_s18 }
   0x6   : > { %p265_p1 = scmp.eq.s32.totalorder %s264_s25, 0  ;;  %p278_p2 = scmp.eq.s32.totalorder %s1298_s21, 1 }
   0x7   : > { %p283_p3 = scmp.ne.s32.totalorder %s1192_s18, %s1188_s17  ;;  %p284_p4 = scmp.eq.s32.totalorder %s982_s22, 1 }
   0x8   : > { %s1313_s26 = scalar_select %p265_p1, %s1196_s19, %s267_s24  }
   0x9   : > { %p1315_p5 = por %p278_p2, %p277_p0  ;;  %p1319_p6 = por %p284_p4, %p283_p3 }
   0xa   : > { %p985_p7 = scmp.ge.s32.totalorder %s1200_s20, 1  ;;  %p340_p8 = scmp.lt.s32.totalorder %s1200_s20, 3 }
   0xc   : > { %p341_p9 = pnand %p985_p7, %p340_p8 }
   0xd   : > { %p380_p10 = scmp.lt.s32.totalorder (!%p341_p9), %s1298_s21, 1  ;;  %v466_v0 = vld [vmem:[%s1532_s2] sm:$0xff] (!%p341_p9)  ;;  %v1202_v1 = vmov (!%p341_p9), 0.0   ;;  %v1203_v2 = vmov (!%p341_p9), 0   ;;  %vm391_vm0 = vcmask (!%p341_p9), 130048   ;;  %vm498_vm3 = vcmask (!%p341_p9), 277504  }
   0xe   : > { %344 = sbr.rel (%p341_p9) target bundleno = 983 (0x3d7), region = 64  ;;  %459 = vmatprep.mubr.f32.mxu0 (!%p341_p9), %v1202_v1  ;;  %1101 = vset.pattern.permute.xlu0 (!%p341_p9), %v1203_v2  ;;  %v1333_v3 = vld [vmem:[%s1540_s10] sm:$0xf] (!%p341_p9)  ;;  %s1205_s15 = smov (!%p341_p9), 124   ;;  %v835_v32 = vld [vmem:[%s1538_s8 + $0x8] sm:$0xff] (!%p341_p9)  ;;  %v505_v38 = vlaneseq (!%p341_p9)  ;;  %vm619_vm5 = vcmask (!%p341_p9), 1031168  }
   0xf   : > { %469 = vperm.xlu0 (!%p341_p9), %1101, %v466_v0   ;;  %1040 = vpush (!%p341_p9), %v1333_v3  ;;  %715 = vmatprep.mubr.f32.mxu1 (!%p341_p9), %v1202_v1  ;;  %v474_v4 = vld [vmem:[%s1533_s3] sm:$0xff] (!%p341_p9)  ;;  %s1206_s16 = smov (!%p341_p9), 126   ;;  %s1208_s24 = smov (!%p341_p9), 96   ;;  %v851_v33 = vld [vmem:[%s1539_s9 + $0x8] sm:$0xff] (!%p341_p9)  ;;  %v740_v35 = vrot.slane (!%p341_p9), %v1333_v3, 1  ;;  %vm567_vm7 = vcmask (!%p341_p9), 785408  }
  0x10   : > { %1137 = vset.pattern.permute.xlu1 (!%p341_p9), %v1203_v2  ;;  %v390_v11 = vld [vmem:[%s1531_s1] sm:$0xff] (!%p341_p9)  ;;  %s1209_s25 = smov (!%p341_p9), 64   ;;  %s1211_s30 = smov (!%p341_p9), 62   ;;  %v506_v41 = vand.u32 (!%p341_p9), 127, %v505_v38  ;;  %vm1213_vm8 = vmmov (!%p341_p9), 1   ;;  %vm554_vm10 = vcmask (!%p341_p9), 1014784  }
  0x11   : > { %s1212_s12 = smov (!%p341_p9), 60   ;;  %v730_v31 = vld [vmem:[%s1536_s6] sm:$0xff] (!%p341_p9)  ;;  %1042 = vpush (!%p341_p9), %v740_v35  ;;  %vm630_vm14 = vcmask (!%p341_p9), 769024   ;;  %v749_v62 = vld [vmem:[%s1537_s7 + $0x8] sm:$0xff] (!%p341_p9) }
  0x12   : > { %v722_v34 = vld [vmem:[%s1535_s5] sm:$0xff] (!%p341_p9)  ;;  %v507_v44 = vadd.s32 (!%p341_p9), 128, %v506_v41  ;;  %v512_v48 = vand.u32 (!%p341_p9), 15, %v506_v41 }
  0x13   : > { %477 = vperm.xlu0 (!%p341_p9), %1101, %v474_v4   ;;  %v834_v36 = vld [vmem:[%s1538_s8] sm:$0xff] (!%p341_p9) }
  0x14   : > { %v850_v37 = vld [vmem:[%s1539_s9] sm:$0xff] (!%p341_p9)  ;;  %v519_v47 = vand.u32 (!%p341_p9), 15, %v507_v44  ;;  %vm1399_vm6 = vcmp.ge.s32.totalorder (!%p341_p9), %v512_v48, 2  ;;  %vm1423_vm13 = vcmp.lt.s32.totalorder (!%p341_p9), %v512_v48, 14  ;;  %v890_v48 = vrot.slane (!%p341_p9), %v1333_v3, 3 }
  0x15   : > { %s381_s14 = scalar_select %p380_p10, %s1298_s21, 1  ;;  %vm1419_vm12 = vmpackc.low %vm1213_vm8, %vm1399_vm6 }
  0x16   : > { %vm1395_vm4 = vcmp.ge.s32.totalorder %v519_v47, 2  ;;  %vm1410_vm11 = vcmp.lt.s32.totalorder %v519_v47, 14  ;;  %v870_v47 = vrot.slane %v1333_v3, 2  ;;  %v748_v3 = vld [vmem:[%s1537_s7] sm:$0xff] }
  0x17   : > { %s1010_s22 = sshll.u32 %s381_s14, 5  ;;  %s1204_s14 = smov 34   ;;  %vm1406_vm9 = vmpackc.low %vm1213_vm8, %vm1395_vm4 }
  0x18   : > { %s384_s29 = scalar_lea.vmem %s1530_s0, %s1010_s22  ;;  %s1207_s22 = smov 92   ;;  %vm1023_vm15 = vmpackc.low %vm1395_vm4, %vm1410_vm11  ;;  %vm641_vm4 = vcmask 506880   ;;  %1044 = vpush %v870_v47 }
  0x19   : > { %v1344_v5 = vld [vmem:[%s384_s29 + $0x8] sm:$0xff]  ;;  %v1346_v6 = vld [vmem:[%s384_s29 + $0x18] sm:$0xff]  ;;  %v1348_v7 = vld [vmem:[%s384_s29] sm:$0xff]  ;;  %1046 = vpush %v890_v48 }
  0x1a   : > { %v1012_v8 = vpack.c.bf16 %v1346_v6, %v1344_v5  ;;  %v1352_v9 = vld [vmem:[%s384_s29 + $0x10] sm:$0xff]  ;;  %s1210_s29 = smov 94  }
  0x1b   : > { %v1014_v10 = vpack.c.bf16 %v1352_v9, %v1348_v7 }
  0x1c   : > { %1013 = vmatprep.subr.bf16.mxu0 %v1012_v8 }
  0x1d   : > { %1015 = vmatpush1.bf16.msra.mxu0 %v1014_v10 }
  0x20   : > { %989 = vmatmul.mubr.msk.f32.vlgmr.msra.gmra.mrb[0].mxu0 %vm391_vm0, %v390_v11  ;;  %vm580_vm0 = vcmask 752640  }
  0x21   : > { %821 = vmatprep.mubr.f32.mxu0 %v1202_v1 }
  0x40   : > { %s1041_s13 = spop %1040 }
  0x41   : > { %v486_v18 = vstv %s1041_s13  ;;  %s377_s13 = sand.u32 1, %s1192_s18  }
  0x8e   : > { %v470_v12 = vpop.permute.xlu0 %469 }
  0x92   : > { %v478_v16 = vpop.permute.xlu0 %477 }
  0xf3   : > { %v461_v13 = vpop.f32.mrb[0].mxu0 }
  0xf4   : > { %v472_v14 = vmul.f32 %v470_v12, %v461_v13  ;;  %v463_v15 = vpop.f32.mrb[1].mxu0 }
  0xf5   : > { %v473_v17 = vmul.f32 %v470_v12, %v463_v15 }
  0xf6   : > { %v480_v19 = vadd.f32 %v478_v16, %v472_v14 }
  0xf7   : > { %v481_v20 = vadd.f32 %v478_v16, %v473_v17 }
  0xf8   : > { %v488_v21 = vmul.f32 %v486_v18, %v480_v19  ;;  %vm482_vm1 = vcmp.ge.f32.partialorder %v480_v19, 0.0 }
  0xf9   : > { %v489_v22 = vmul.f32 %v486_v18, %v481_v20  ;;  %vm483_vm2 = vcmp.ge.f32.partialorder %v481_v20, 0.0 }
  0xfa   : > { %v490_v23 = vsel %vm482_vm1, %v480_v19, %v488_v21  ;;  %vm1026_vm1 = vmpackc.low %vm1399_vm6, %vm1423_vm13  ;;  %vm606_vm6 = vcmask 490496  }
  0xfb   : > { %494 = vrot.lane.b32.xlu1 %v490_v23, %s1204_s14  ;;  %v491_v24 = vsel %vm483_vm2, %v481_v20, %v489_v22  ;;  %vm1029_vm2 = vmpackc.low %vm1410_vm11, %vm1213_vm8 }
  0xff   : > { %496 = vrot.lane.b32.xlu1 %v491_v24, %s1204_s14 }
 0x16d   : > { %v495_v25 = vpop.permute.xlu1 %494 }
 0x16e   : > { %v1360_v26 = vsel %vm498_vm3, 0.0, %v495_v25 }
 0x16f   : > { %548 = vrot.lane.b32.xlu0 %v1360_v26, %s1205_s15  ;;  %613 = vrot.lane.b32.xlu1 %v1360_v26, %s1206_s16 }
 0x171   : > { %v497_v27 = vpop.permute.xlu1 %496 }
 0x172   : > { %v1366_v28 = vsel %vm498_vm3, %v495_v25, %v497_v27  ;;  %v504_v29 = vsel %vm498_vm3, %v497_v27, 0.0  ;;  %vm593_vm3 = vcmask 523264  }
 0x173   : > { %574 = vrot.lane.b32.xlu0 %v1360_v26, %s1207_s22  ;;  %561 = vrot.lane.b32.xlu1 %v1360_v26, %s1208_s24  ;;  %v1112_v30 = vpack.i.bf16 %v504_v29, %v1366_v28 }
 0x177   : > { %587 = vrot.lane.b32.xlu0 %v1360_v26, %s1209_s25  ;;  %624 = vrot.lane.b32.xlu1 %v1360_v26, %s1210_s29 }
 0x17b   : > { %1113 = vrot.lane.b32.xlu1 %v1112_v30, %s1208_s24  ;;  %1103 = vrot.lane.b32.xlu0 %v1112_v30, %s1206_s16  ;;  %s986_s16 = sshll.u32 %s377_s13, 5  ;;  %s1011_s24 = sshll.u32 %s1298_s21, 9 }
 0x17c   : > { %s1489_s21 = scalar_lea.sflag [#allocation3], %s377_s13 }
 0x17f   : > { %1123 = vrot.lane.b32.xlu1 %v1112_v30, %s1210_s29  ;;  %1108 = vrot.lane.b32.xlu0 %v1112_v30, %s1205_s15  ;;  %s1043_s15 = spop %1042 }
 0x183   : > { %1133 = vrot.lane.b32.xlu1 %v1112_v30, %s1211_s30  ;;  %1118 = vrot.lane.b32.xlu0 %v1112_v30, %s1207_s22 }
 0x187   : > { %635 = vrot.lane.b32.xlu1 %v1360_v26, %s1211_s30  ;;  %1128 = vrot.lane.b32.xlu0 %v1112_v30, %s1209_s25  ;;  %s1483_s30 = scalar_lea.hbm %s1541_s11, %s1011_s24 }
 0x18b   : > { %604 = vrot.lane.b32.xlu1 %v504_v29, %s1212_s12  ;;  %602 = vrot.lane.b32.xlu0 %v1366_v28, %s1212_s12 }
 0x18f   : > { %600 = vrot.lane.b32.xlu0 %v1360_v26, %s1212_s12  ;;  %725 = vperm.xlu1 %1137, %v722_v34   ;;  %s1045_s12 = spop %1044 }
 0x190   : > { %s1047_s14 = spop %1046 }
 0x193   : > { %733 = vperm.xlu0 %1101, %v730_v31   ;;  %838 = vperm.xlu1 %1137, %v834_v36  }
 0x197   : > { %843 = vperm.xlu0 %1101, %v835_v32   ;;  %854 = vperm.xlu1 %1137, %v850_v37  }
 0x19b   : > { %859 = vperm.xlu0 %1101, %v851_v33  }
 0x1e1   : > { %v549_v39 = vpop.permute.xlu0 %548  ;;  %v614_v40 = vpop.permute.xlu1 %613 }
 0x1e5   : > { %v575_v42 = vpop.permute.xlu0 %574  ;;  %v562_v43 = vpop.permute.xlu1 %561 }
 0x1e9   : > { %v1393_v45 = vpop.permute.xlu0 %587  ;;  %v625_v46 = vpop.permute.xlu1 %624 }
 0x1ed   : > { %v1104_v49 = vpop.permute.xlu0 %1103  ;;  %v1114_v50 = vpop.permute.xlu1 %1113 }
 0x1ee   : > { %v1106_v52 = vunpack.i.h.bf16 %v1104_v49  ;;  %v1105_v53 = vunpack.i.l.bf16 %v1104_v49  ;;  %v1116_v55 = vunpack.i.h.bf16 %v1114_v50  ;;  %v1115_v56 = vunpack.i.l.bf16 %v1114_v50 }
 0x1f0   : > { %v621_v57 = vsel %vm619_vm5, %v1105_v53, %v1106_v52  ;;  %v620_v59 = vsel %vm619_vm5, %v614_v40, %v1105_v53  ;;  %v568_v13 = vsel %vm567_vm7, %v562_v43, %v1115_v56  ;;  %v569_v14 = vsel %vm567_vm7, %v1115_v56, %v1116_v55  ;;  %vm1032_vm5 = vmpackc.low %vm1423_vm13, %vm1213_vm8 }
 0x1f1   : > { %v1109_v60 = vpop.permute.xlu0 %1108  ;;  %v1124_v61 = vpop.permute.xlu1 %1123  ;;  %v1016_v63 = vpack.c.bf16 %v621_v57, %v1366_v28  ;;  %v1019_v0 = vpack.c.bf16 %v620_v59, %v1360_v26  ;;  %vm647_vm7 = vcmask 588800   ;;  %v742_v55 = vstv %s1043_s15  ;;  %s379_s15 = scalar_lea.vmem [#allocation2], %s986_s16 }
 0x1f2   : > { %v1111_v4 = vunpack.i.h.bf16 %v1109_v60  ;;  %v1110_v8 = vunpack.i.l.bf16 %v1109_v60  ;;  %v1126_v11 = vunpack.i.h.bf16 %v1124_v61  ;;  %v1125_v12 = vunpack.i.l.bf16 %v1124_v61  ;;  %s920_s22 = sshll.u32 %s379_s15, 4  ;;  %s1485_s22 = int_to_ptr.vmem [resolvable:$true] %s920_s22 }
 0x1f3   : > { %1018 = vmatprep.subr.msk.bf16.mxu1 %vm1406_vm9, %v1016_v63 }
 0x1f4   : > { %v555_v15 = vsel %vm554_vm10, %v549_v39, %v1110_v8  ;;  %v556_v16 = vsel %vm554_vm10, %v1110_v8, %v1111_v4  ;;  %1021 = vmatpush1.bf16.msk.msra.mxu1 %vm1419_vm12, %v1019_v0  ;;  %v631_v23 = vsel %vm630_vm14, %v625_v46, %v1125_v12  ;;  %v632_v24 = vsel %vm630_vm14, %v1125_v12, %v1126_v11  ;;  %v646_v46 = vld [vmem:[%s1534_s4] sm:$0xff] }
 0x1f5   : > { %v1022_v17 = vpack.c.bf16 %v569_v14, %v556_v16  ;;  %v1025_v18 = vpack.c.bf16 %v568_v13, %v555_v15  ;;  %v1119_v19 = vpop.permute.xlu0 %1118  ;;  %v1134_v20 = vpop.permute.xlu1 %1133  ;;  %vm750_vm10 = vcmask 64512   ;;  %v872_v12 = vstv %s1045_s12  ;;  %s1138_s12 = scalar_lea.vmem %s1485_s22, 512 }
 0x1f6   : > { %v1121_v21 = vunpack.i.h.bf16 %v1119_v19  ;;  %v1120_v22 = vunpack.i.l.bf16 %v1119_v19  ;;  %v1136_v27 = vunpack.i.h.bf16 %v1134_v20  ;;  %v1135_v28 = vunpack.i.l.bf16 %v1134_v20  ;;  %p1139_p11 = scmp.ne.s32.totalorder %s1485_s22, %s1138_s12 }
 0x1f7   : > { %1024 = vmatprep.subr.msk.bf16.mxu1 %vm1023_vm15, %v1022_v17 }
 0x1f8   : > { %v581_v25 = vsel %vm580_vm0, %v575_v42, %v1120_v22  ;;  %v582_v26 = vsel %vm580_vm0, %v1120_v22, %v1121_v21  ;;  %1027 = vmatpush1.bf16.msk.msra.mxu1 %vm1026_vm1, %v1025_v18  ;;  %v643_v38 = vsel %vm641_vm4, %v1135_v28, %v1136_v27  ;;  %p1140_p12 = pnand %p1139_p11, %p1315_p5 }
 0x1f9   : > { %v1028_v29 = vpack.c.bf16 %v582_v26, %v632_v24  ;;  %v1031_v30 = vpack.c.bf16 %v581_v25, %v631_v23  ;;  %v1129_v31 = vpop.permute.xlu0 %1128  ;;  %v636_v32 = vpop.permute.xlu1 %635  ;;  %v892_v23 = vstv %s1047_s14  ;;  %s1214_s14 = smov [#allocation2]  }
 0x1fa   : > { %v1131_v33 = vunpack.i.h.bf16 %v1129_v31  ;;  %v1130_v34 = vunpack.i.l.bf16 %v1129_v31  ;;  %v642_v37 = vsel %vm641_vm4, %v636_v32, %v1135_v28  ;;  %p1141_p13 = pneg %p1140_p12  ;;  %s1142_s16 = sshll.u32 %s1214_s14, 4  ;;  %s1143_s16 = int_to_ptr.vmem [resolvable:$false] %s1142_s16 }
 0x1fb   : > { %1030 = vmatprep.subr.msk.bf16.mxu1 %vm1029_vm2, %v1028_v29  ;;  %s1144_s24 = scalar_lea.vmem %s1143_s16, 1024  ;;  %p1145_p0 = scmp.lt.s32.totalorder %s1485_s22, %s1143_s16 }
 0x1fc   : > { %v594_v35 = vsel %vm593_vm3, %v1393_v45, %v1130_v34  ;;  %v595_v36 = vsel %vm593_vm3, %v1130_v34, %v1131_v33  ;;  %1033 = vmatpush1.bf16.msk.msra.mxu1 %vm1032_vm5, %v1031_v30  ;;  %p1146_p1 = scmp.lt.s32.totalorder %s1144_s24, %s1138_s12 }
 0x1fd   : > { %v1034_v39 = vpack.c.bf16 %v643_v38, %v595_v36  ;;  %v1037_v40 = vpack.c.bf16 %v642_v37, %v594_v35  ;;  %v603_v41 = vpop.permute.xlu0 %602  ;;  %v605_v42 = vpop.permute.xlu1 %604 }
 0x1fe   : > { %v608_v43 = vsel %vm606_vm6, %v603_v41, %v605_v42  ;;  %p1147_p2 = por %p1146_p1, %p1145_p0 }
 0x1ff   : > { %1036 = vmatprep.subr.msk.bf16.mxu1 %vm1406_vm9, %v1034_v39 }
 0x200   : > { %1039 = vmatpush1.bf16.msk.msra.mxu1 %vm1419_vm12, %v1037_v40  ;;  %p1148_p3 = pnand %p1147_p2, %p1141_p13 }
 0x201   : > { %v601_v44 = vpop.permute.xlu0 %600  ;;  %1000 = vmatprep.subr.msk.mxu1 %vm1410_vm11, %v608_v43 }
 0x202   : > { %v607_v45 = vsel %vm606_vm6, %v601_v44, %v603_v41 }
 0x204   : > { %1001 = vmatpush1.msk.msra.mxu1 %vm1423_vm13, %v607_v45 }
 0x205   : > { %1002 = vmatmul.mubr.msk.f32.vlgmr.msra.gmra.mrb[0].mxu1 %vm647_vm7, %v646_v46 }
 0x20e   : > { %v726_v49 = vpop.permute.xlu1 %725 }
 0x212   : > { %v734_v53 = vpop.permute.xlu0 %733  ;;  %v839_v63 = vpop.permute.xlu1 %838 }
 0x216   : > { %v844_v0 = vpop.permute.xlu0 %843  ;;  %v855_v10 = vpop.permute.xlu1 %854 }
 0x21a   : > { %v860_v18 = vpop.permute.xlu0 %859 }
 0x2d8   : > { %v717_v50 = vpop.f32.mrb[0].mxu1 }
 0x2d9   : > { %v728_v51 = vmul.f32 %v726_v49, %v717_v50  ;;  %v719_v52 = vpop.f32.mrb[1].mxu1 }
 0x2da   : > { %v729_v54 = vmul.f32 %v726_v49, %v719_v52 }
 0x2db   : > { %v736_v56 = vadd.f32 %v734_v53, %v728_v51 }
 0x2dc   : > { %v737_v57 = vadd.f32 %v734_v53, %v729_v54 }
 0x2dd   : > { %v744_v58 = vmul.f32 %v742_v55, %v736_v56  ;;  %vm738_vm9 = vcmp.ge.f32.partialorder %v736_v56, 0.0 }
 0x2de   : > { %v745_v59 = vmul.f32 %v742_v55, %v737_v57  ;;  %vm739_vm8 = vcmp.ge.f32.partialorder %v737_v57, 0.0 }
 0x2df   : > { %v746_v61 = vsel %vm738_vm9, %v736_v56, %v744_v58 }
 0x2e0   : > { %v747_v60 = vsel %vm739_vm8, %v737_v57, %v745_v59 }
 0x2e1   : > { %757 = vmatprep.subr.mxu0 %v747_v60 }
 0x2e2   : > { %758 = vmatpush1.msra.mxu0 %v746_v61 }
 0x2e3   : > { %1003 = vmatmul.mubr.msk.f32.vlgmr.msra.gmra.mrb[2].mxu0 %vm750_vm10, %v748_v3 }
 0x2e4   : > { %827 = vmatprep.mubr.f32.mxu0 %v1202_v1 }
 0x2e7   : > { %1004 = vmatmul.mubr.msk.f32.gmra.mrb[4].mxu0 %vm750_vm10, %v749_v62 }
 0x3b6   : > { %v823_v2 = vpop.f32.mrb[2].mxu0 }
 0x3b7   : > { %v846_v4 = vmul.f32 %v839_v63, %v823_v2  ;;  %v825_v8 = vpop.f32.mrb[3].mxu0 }
 0x3b8   : > { %v847_v11 = vmul.f32 %v839_v63, %v825_v8 }
 0x3b9   : > { %v862_v13 = vadd.f32 %v855_v10, %v846_v4 }
 0x3ba   : > { %v863_v14 = vadd.f32 %v855_v10, %v847_v11  ;;  %v829_v15 = vpop.f32.mrb[4].mxu0 }
 0x3bb   : > { %vm866_vm11 = vcmp.ge.f32.partialorder %v862_v13, 0.0  ;;  %v874_v1 = vmul.f32 %v872_v12, %v862_v13  ;;  %v848_v16 = vmul.f32 %v844_v0, %v829_v15  ;;  %v831_v17 = vpop.f32.mrb[5].mxu0 }
 0x3bc   : > { %vm867_vm12 = vcmp.ge.f32.partialorder %v863_v14, 0.0  ;;  %v875_v19 = vmul.f32 %v872_v12, %v863_v14  ;;  %v849_v20 = vmul.f32 %v844_v0, %v831_v17 }
 0x3bd   : > { %v878_v21 = vsel %vm866_vm11, %v862_v13, %v874_v1  ;;  %v864_v22 = vadd.f32 %v860_v18, %v848_v16 }
 0x3be   : > { %v879_v24 = vsel %vm867_vm12, %v863_v14, %v875_v19  ;;  %v865_v25 = vadd.f32 %v860_v18, %v849_v20  ;;  %v882_v26 = vadd.f32 %v878_v21, %v1348_v7 }
 0x3bf   : > { %vm868_vm13 = vcmp.ge.f32.partialorder %v864_v22, 0.0  ;;  %v876_v27 = vmul.f32 %v872_v12, %v864_v22  ;;  %v883_v28 = vadd.f32 %v879_v24, %v1344_v5 }
 0x3c0   : > { %vm869_vm14 = vcmp.ge.f32.partialorder %v865_v25, 0.0  ;;  %v877_v29 = vmul.f32 %v872_v12, %v865_v25  ;;  %vm886_vm15 = vcmp.ge.f32.partialorder %v882_v26, 0.0  ;;  %v894_v30 = vmul.f32 %v892_v23, %v882_v26 }
 0x3c1   : > { %v880_v31 = vsel %vm868_vm13, %v864_v22, %v876_v27  ;;  %vm887_vm0 = vcmp.ge.f32.partialorder %v883_v28, 0.0  ;;  %v895_v32 = vmul.f32 %v892_v23, %v883_v28 }
 0x3c2   : > { %v884_v33 = vadd.f32 %v880_v31, %v1352_v9  ;;  %v881_v34 = vsel %vm869_vm14, %v865_v25, %v877_v29  ;;  %v898_v35 = vsel %vm886_vm15, %v882_v26, %v894_v30 }
 0x3c3   : > { %v885_v7 = vadd.f32 %v881_v34, %v1346_v6  ;;  %v899_v36 = vsel %vm887_vm0, %v883_v28, %v895_v32  ;;  %902 = vst [vmem:[%s379_s15] sm:$0xff] %v898_v35 }
 0x3c4   : > { %vm888_vm1 = vcmp.ge.f32.partialorder %v884_v33, 0.0  ;;  %v896_v5 = vmul.f32 %v892_v23, %v884_v33  ;;  %903 = vst [vmem:[%s379_s15 + $0x8] sm:$0xff] %v899_v36 }
 0x3c5   : > { %vm889_vm2 = vcmp.ge.f32.partialorder %v885_v7, 0.0  ;;  %v897_v37 = vmul.f32 %v892_v23, %v885_v7 }
 0x3c6   : > { %v900_v9 = vsel %vm888_vm1, %v884_v33, %v896_v5 }
 0x3c7   : > { %v901_v6 = vsel %vm889_vm2, %v885_v7, %v897_v37  ;;  %904 = vst [vmem:[%s379_s15 + $0x10] sm:$0xff] %v900_v9 }
 0x3c8   : > { %905 = vst [vmem:[%s379_s15 + $0x18] sm:$0xff] %v901_v6 }
 0x3c9   : > { %1151 = shalt.err (!%p1148_p3)
}
 0x3ca   : > { %s1152_s13 = scalar_lea.hbm %s1483_s30, 512  ;;  %s1156_s29 = scalar_lea.hbm %s1541_s11, 1024 }
 0x3cb   : > { %p1153_p4 = scmp.ne.s32.totalorder %s1483_s30, %s1152_s13  ;;  %p1157_p9 = scmp.lt.u32.totalorder %s1483_s30, %s1541_s11 }
 0x3cc   : > { %p1158_p10 = scmp.lt.u32.totalorder %s1156_s29, %s1152_s13  ;;  %p1160_p12 = scmp.lt.u32.totalorder %s1152_s13, %s1483_s30 }
 0x3cd   : > { %p1154_p7 = pnand %p1153_p4, %p1315_p5 }
 0x3ce   : > { %p1159_p11 = por %p1158_p10, %p1157_p9 }
 0x3cf   : > { %p1155_p8 = pneg %p1154_p7 }
 0x3d0   : > { %p1161_p13 = por %p1160_p12, %p1159_p11 }
 0x3d2   : > { %p1162_p0 = pnand %p1161_p13, %p1155_p8 }
 0x3d4   : > { %1165 = shalt.err (!%p1162_p0)
}
 0x3d5   : > { %s1215_s12 = smov 256   ;;  %s1216_s24 = smov 16  }
 0x3d6   : > { %1048 = dma.vmem_to_hbm [thread:$0]  (%p1315_p5), %s1485_s22, 512, %s1483_s30, %s1489_s21, %s1215_s12, %s1215_s12, %s1216_s24  }
 0x3d7 PF: > { %p1054_p1 = scmp.ge.s32.totalorder %s1200_s20, 2  ;;  %s935_s15 = sand.u32 1, %s1188_s17  }
 0x3d8   : > { %s936_s13 = scalar_lea.sflag [#allocation3], %s935_s15 }
 0x3d9   : > { %p1051_p2 = pnand %p1054_p1, %p1319_p6 }
 0x3db   : > { %1183 = dma.done.wait (!%p1051_p2), %s936_s13, 512  }
 0x3dc   : > { %1185 = vsyncadd (!%p1051_p2), %s936_s13, 4294966784  ;;  %p21_p3 = scmp.ge.s32.totalorder %s1302_s23, 4   ;;  %s1556_s17 = smov %s1192_s18 }
 0x3dd   : > { %s1557_s18 = smov %s1196_s19  ;;  %s1558_s19 = smov %s1313_s26 }
 0x3de   : > { %s1559_s20 = smov %s1302_s23  ;;  %23 = sbr.rel (!%p21_p3) target bundleno = 3 (0x3), region = 99 }
 0x3e5   :  { %941 = vsyncpa [#allocation3], 1 }
 0x3e6   :  { %943 = vsyncpa [#allocation3 + $0x1], 1 }

</bundles_post_ra>
